<compile_context>
chip_gen: v7x
topology: tpu7x:2x2x1
jax: 0.10.0
libtpu: 0.0.40
codegen_flags: <defaults>
</compile_context>

<pallas_src>
import functools

import jax
import jax.numpy as jnp
from jax.experimental import pallas as pl
from jax.experimental.pallas import tpu as pltpu

# Synthetic "Cora-like" sizes (small, TPU-friendly).
N_NODES = 128       # number of graph nodes
F_IN = 64           # dataset.num_node_features (synthetic)
HIDDEN = 16         # GCNConv hidden size (matches module)
N_CLASSES = 8       # dataset.num_classes (synthetic)
N_EDGES = 512

LANE = 128                     # pad narrow output dims up to full lane width
TILE_N = 512                   # default node-row tile for the scalable path
FUSED_VMEM_BUDGET = 24 << 20   # fuse the whole forward when it fits in ~24 MiB


def _pad_to_lane(d):
    return ((d + LANE - 1) // LANE) * LANE


# ----------------------------------------------------------------------------
# Fused path (small N): whole forward in one pallas_call, h stays on-chip.
# ----------------------------------------------------------------------------
def gcn_fused_kernel(a_ref, x_ref, w1_ref, b1_ref, w2_ref, b2_ref, out_ref):
    """out = A @ ( relu(A @ (X @ W1) + b1) @ W2 ) + b2, single step."""
    a = a_ref[...]                                              # bf16 (N, N)
    xw1 = jnp.dot(x_ref[...], w1_ref[...],
                  preferred_element_type=jnp.float32)           # f32 (N, HP)
    h = jnp.dot(a, xw1.astype(a.dtype),
                preferred_element_type=jnp.float32)             # f32 (N, HP)
    h = jnp.maximum(h + b1_ref[...], 0.0)                       # bias+ReLU in f32
    hw2 = jnp.dot(h.astype(w2_ref.dtype), w2_ref[...],
                  preferred_element_type=jnp.float32)           # f32 (N, CP)
    out = jnp.dot(a, hw2.astype(a.dtype),
                  preferred_element_type=jnp.float32)
    out_ref[...] = (out + b2_ref[...]).astype(out_ref.dtype)


def _gcn_fused(a_bf, x_bf, w1_p, b1_p, w2_p, b2_p):
    n, f = x_bf.shape
    hp = w1_p.shape[1]
    cp = w2_p.shape[1]
    cost = pl.CostEstimate(
        flops=2 * n * (f * hp + n * hp + hp * cp + n * cp),
        transcendentals=0,
        bytes_accessed=(a_bf.size * 2 + x_bf.size * 2 + w1_p.size * 2
                        + w2_p.size * 2 + (b1_p.size + b2_p.size) * 4
                        + n * cp * 4),
    )
    return pl.pallas_call(
        gcn_fused_kernel,
        out_shape=jax.ShapeDtypeStruct((n, cp), jnp.float32),
        cost_estimate=cost,
    )(a_bf, x_bf, w1_p, b1_p, w2_p, b2_p)


# ----------------------------------------------------------------------------
# Scalable path (real N): hoisted feature transform + row-panel aggregation.
# ----------------------------------------------------------------------------
def transform_kernel(x_ref, w_ref, o_ref):
    """Row tile of the feature transform: o = X_tile @ W (f32 acc)."""
    o_ref[...] = jnp.dot(x_ref[...], w_ref[...],
                         preferred_element_type=jnp.float32).astype(o_ref.dtype)


def aggregate_kernel(a_ref, xw_ref, b_ref, o_ref, *, apply_relu):
    """Row panel of the aggregation: o = [relu](A_panel @ XW + b)."""
    h = jnp.dot(a_ref[...], xw_ref[...], preferred_element_type=jnp.float32)
    h = h + b_ref[...]                       # bias (+ ReLU) in f32
    if apply_relu:
        h = jnp.maximum(h, 0.0)
    o_ref[...] = h.astype(o_ref.dtype)


def _gcn_layer_tiled(a_bf, x_bf, w_p, b_p, *, apply_relu, out_dtype, tile_n):
    n = a_bf.shape[0]
    f = x_bf.shape[1]
    hp = w_p.shape[1]
    tile_n = min(tile_n, n)
    assert n % tile_n == 0, "node count must be a multiple of tile_n"
    grid = (n // tile_n,)

    # Stage 1: hoisted feature transform XW = X @ W (computed once for the
    # whole layer, NOT per A-row-panel).  bf16 output feeds the aggregation.
    xw = pl.pallas_call(
        transform_kernel,
        out_shape=jax.ShapeDtypeStruct((n, hp), jnp.bfloat16),
        grid=grid,
        in_specs=[pl.BlockSpec((tile_n, f), lambda i: (i, 0)),
                  pl.BlockSpec((f, hp), lambda i: (0, 0))],
        out_specs=pl.BlockSpec((tile_n, hp), lambda i: (i, 0)),
        compiler_params=pltpu.CompilerParams(
            dimension_semantics=("parallel",)),
        cost_estimate=pl.CostEstimate(
            flops=2 * n * f * hp, transcendentals=0,
            bytes_accessed=x_bf.size * 2 + w_p.size * 2 + n * hp * 2),
    )(x_bf, w_p)

    # Stage 2: stream (tile_n, N) panels of A_hat against the resident XW.
    itemsize = jnp.dtype(out_dtype).itemsize
    vmem_bytes = (2 * tile_n * n * 2             # A panels, double-buffered
                  + n * hp * 2                   # XW resident (bf16)
                  + 2 * tile_n * hp * itemsize   # out tiles, double-buffered
                  + hp * 4 + (2 << 20))          # bias + slack
    vmem_limit = int(min(max(vmem_bytes, 16 << 20), 48 << 20))  # v7x headroom

    kernel = functools.partial(aggregate_kernel, apply_relu=apply_relu)
    return pl.pallas_call(
        kernel,
        out_shape=jax.ShapeDtypeStruct((n, hp), out_dtype),
        grid=grid,
        in_specs=[pl.BlockSpec((tile_n, n), lambda i: (i, 0)),   # A row panel
                  pl.BlockSpec((n, hp), lambda i: (0, 0)),       # XW resident
                  pl.BlockSpec((1, hp), lambda i: (0, 0))],      # bias
        out_specs=pl.BlockSpec((tile_n, hp), lambda i: (i, 0)),
        compiler_params=pltpu.CompilerParams(
            dimension_semantics=("parallel",),
            vmem_limit_bytes=vmem_limit),
        cost_estimate=pl.CostEstimate(
            flops=2 * n * n * hp, transcendentals=0,
            bytes_accessed=(a_bf.size * 2 + n * hp * 2 + hp * 4
                            + n * hp * itemsize)),
    )(a_bf, xw, b_p)


# ----------------------------------------------------------------------------
# Forward wrapper.
# ----------------------------------------------------------------------------
def gcn_forward(a_hat, x, w1, b1, w2, b2, *, tile_n=TILE_N, fused=None):
    """forward(data) = GCNConv2(relu(GCNConv1(x))); returns f32 class logits."""
    n, f = x.shape
    hidden = w1.shape[1]
    n_classes = w2.shape[1]
    hp = _pad_to_lane(hidden)
    cp = _pad_to_lane(n_classes)

    # bf16 matmul operands; zero-pad the narrow output dims to lane width so
    # every matmul / store is lane-dense.
    a_bf = a_hat.astype(jnp.bfloat16)
    x_bf = x.astype(jnp.bfloat16)
    w1_p = jnp.zeros((f, hp), jnp.bfloat16).at[:, :hidden].set(
        w1.astype(jnp.bfloat16))
    b1_p = jnp.zeros((1, hp), jnp.float32).at[:, :hidden].set(b1)
    w2_p = jnp.zeros((hp, cp), jnp.bfloat16).at[:hidden, :n_classes].set(
        w2.astype(jnp.bfloat16))
    b2_p = jnp.zeros((1, cp), jnp.float32).at[:, :n_classes].set(b2)

    if fused is None:
        # Fuse the whole forward when the working set comfortably fits VMEM.
        working_set = (n * n * 2 + n * f * 2 + f * hp * 2 + hp * cp * 2
                       + 2 * n * hp * 4 + n * cp * 4)
        fused = working_set <= FUSED_VMEM_BUDGET

    if fused:
        out_p = _gcn_fused(a_bf, x_bf, w1_p, b1_p, w2_p, b2_p)
    else:
        h = _gcn_layer_tiled(a_bf, x_bf, w1_p, b1_p, apply_relu=True,
                             out_dtype=jnp.bfloat16, tile_n=tile_n)
        out_p = _gcn_layer_tiled(a_bf, h, w2_p, b2_p, apply_relu=False,
                                 out_dtype=jnp.float32, tile_n=tile_n)
    return out_p[:, :n_classes]


# ----------------------------------------------------------------------------
# Glue: dense normalized adjacency + init (not kernel code).
# ----------------------------------------------------------------------------
def build_normalized_adjacency(edge_index, num_nodes):
    """Dense A_hat = D^{-1/2}(A + I)D^{-1/2}, PyG GCNConv normalization."""
    src, dst = edge_index[0], edge_index[1]
    a = jnp.zeros((num_nodes, num_nodes), jnp.float32)
    # scatter-ADD (PyG semantics: duplicate edges accumulate); A[dst, src] += 1
    # so that (A @ x)[i] aggregates messages from neighbors j -> i.
    a = a.at[dst, src].add(1.0)
    a = a + jnp.eye(num_nodes, dtype=jnp.float32)   # add self-loops
    deg = jnp.sum(a, axis=1)
    d_inv_sqrt = jnp.where(deg > 0, 1.0 / jnp.sqrt(deg), 0.0)
    return d_inv_sqrt[:, None] * a * d_inv_sqrt[None, :]


def glorot(key, shape):
    fan_in, fan_out = shape
    limit = jnp.sqrt(6.0 / (fan_in + fan_out))
    return jax.random.uniform(key, shape, jnp.float32, -limit, limit)


if __name__ == "__main__":
    key = jax.random.PRNGKey(0)
    k_x, k_e, k_w1, k_w2 = jax.random.split(key, 4)

    # Node features and a random edge list (synthetic Cora-like graph).
    x = jax.random.normal(k_x, (N_NODES, F_IN), jnp.float32)
    edge_index = jax.random.randint(k_e, (2, N_EDGES), 0, N_NODES, jnp.int32)
    a_hat = build_normalized_adjacency(edge_index, N_NODES)

    # Parameters (shapes from GCNConv(F_IN, 16), GCNConv(16, N_CLASSES)).
    w1 = glorot(k_w1, (F_IN, HIDDEN))
    b1 = jnp.zeros((1, HIDDEN), jnp.float32)
    w2 = glorot(k_w2, (HIDDEN, N_CLASSES))
    b2 = jnp.zeros((1, N_CLASSES), jnp.float32)

    # Fused small-N path (auto-selected at this size).
    out_fused = jax.block_until_ready(gcn_forward(a_hat, x, w1, b1, w2, b2))
    assert out_fused.shape == (N_NODES, N_CLASSES)

    # Scalable path (hoisted XW + streamed A panels), tile_n=64 so the
    # parallel grid has 2 steps (exercises v7x megacore sharding).
    out_tiled = jax.block_until_ready(
        gcn_forward(a_hat, x, w1, b1, w2, b2, fused=False, tile_n=64))
    assert out_tiled.shape == (N_NODES, N_CLASSES)

    # Plain-JAX reference with the same bf16-operand / f32-accumulate numerics.
    a_bf = a_hat.astype(jnp.bfloat16)
    xw = jnp.dot(x.astype(jnp.bfloat16), w1.astype(jnp.bfloat16),
                 preferred_element_type=jnp.float32)
    h_ref = jnp.maximum(
        jnp.dot(a_bf, xw.astype(jnp.bfloat16),
                preferred_element_type=jnp.float32) + b1, 0.0
    ).astype(jnp.bfloat16)
    hw = jnp.dot(h_ref, w2.astype(jnp.bfloat16),
                 preferred_element_type=jnp.float32)
    out_ref = jnp.dot(a_bf, hw.astype(jnp.bfloat16),
                      preferred_element_type=jnp.float32) + b2

    assert jnp.allclose(out_fused, out_ref, atol=1e-2, rtol=1e-2)
    assert jnp.allclose(out_tiled, out_ref, atol=1e-2, rtol=1e-2)
    assert jnp.allclose(out_fused, out_tiled, atol=1e-2, rtol=1e-2)

    print("KERNEL_OK")
</pallas_src>

<mosaic_0001>
module attributes {stable_mosaic.version = 11 : i64} {
  func.func @gcn_fused_kernel(%arg0: memref<128x128xbf16, #tpu.memory_space<vmem>>, %arg1: memref<128x64xbf16, #tpu.memory_space<vmem>>, %arg2: memref<64x128xbf16, #tpu.memory_space<vmem>>, %arg3: memref<1x128xf32, #tpu.memory_space<vmem>>, %arg4: memref<128x128xbf16, #tpu.memory_space<vmem>>, %arg5: memref<1x128xf32, #tpu.memory_space<vmem>>, %arg6: memref<128x128xf32, #tpu.memory_space<vmem>>) attributes {dimension_semantics = [], scalar_prefetch = 0 : i64, scratch_operands = 0 : i64, tpu.core_type = #tpu.core_type<tc>} {
    %c0 = arith.constant 0 : index
    %c0_0 = arith.constant 0 : index
    %0 = vector.load %arg0[%c0, %c0_0] : memref<128x128xbf16, #tpu.memory_space<vmem>>, vector<128x128xbf16>
    %c0_1 = arith.constant 0 : index
    %c0_2 = arith.constant 0 : index
    %1 = vector.load %arg1[%c0_1, %c0_2] : memref<128x64xbf16, #tpu.memory_space<vmem>>, vector<128x64xbf16>
    %c0_3 = arith.constant 0 : index
    %c0_4 = arith.constant 0 : index
    %2 = vector.load %arg2[%c0_3, %c0_4] : memref<64x128xbf16, #tpu.memory_space<vmem>>, vector<64x128xbf16>
    %cst = arith.constant dense<0.000000e+00> : vector<128x128xf32>
    %3 = tpu.matmul %1, %2, %cst {dimension_numbers = #tpu.dot_dimension_numbers<[1], [0], [0], [1], [0, 0, 1, 1], [], []>} : vector<128x64xbf16>, vector<64x128xbf16>, vector<128x128xf32> -> vector<128x128xf32>
    %4 = arith.truncf %3 : vector<128x128xf32> to vector<128x128xbf16>
    %cst_5 = arith.constant dense<0.000000e+00> : vector<128x128xf32>
    %5 = tpu.matmul %0, %4, %cst_5 {dimension_numbers = #tpu.dot_dimension_numbers<[1], [0], [0], [1], [0, 0, 1, 1], [], []>} : vector<128x128xbf16>, vector<128x128xbf16>, vector<128x128xf32> -> vector<128x128xf32>
    %c0_6 = arith.constant 0 : index
    %c0_7 = arith.constant 0 : index
    %6 = vector.load %arg3[%c0_6, %c0_7] : memref<1x128xf32, #tpu.memory_space<vmem>>, vector<1x128xf32>
    %7 = vector.broadcast %6 : vector<1x128xf32> to vector<128x128xf32>
    %8 = arith.addf %5, %7 : vector<128x128xf32>
    %cst_8 = arith.constant 0.000000e+00 : f32
    %9 = vector.broadcast %cst_8 : f32 to vector<128x128xf32>
    %10 = arith.maximumf %8, %9 : vector<128x128xf32>
    %11 = arith.truncf %10 : vector<128x128xf32> to vector<128x128xbf16>
    %c0_9 = arith.constant 0 : index
    %c0_10 = arith.constant 0 : index
    %12 = vector.load %arg4[%c0_9, %c0_10] : memref<128x128xbf16, #tpu.memory_space<vmem>>, vector<128x128xbf16>
    %cst_11 = arith.constant dense<0.000000e+00> : vector<128x128xf32>
    %13 = tpu.matmul %11, %12, %cst_11 {dimension_numbers = #tpu.dot_dimension_numbers<[1], [0], [0], [1], [0, 0, 1, 1], [], []>} : vector<128x128xbf16>, vector<128x128xbf16>, vector<128x128xf32> -> vector<128x128xf32>
    %14 = arith.truncf %13 : vector<128x128xf32> to vector<128x128xbf16>
    %cst_12 = arith.constant dense<0.000000e+00> : vector<128x128xf32>
    %15 = tpu.matmul %0, %14, %cst_12 {dimension_numbers = #tpu.dot_dimension_numbers<[1], [0], [0], [1], [0, 0, 1, 1], [], []>} : vector<128x128xbf16>, vector<128x128xbf16>, vector<128x128xf32> -> vector<128x128xf32>
    %c0_13 = arith.constant 0 : index
    %c0_14 = arith.constant 0 : index
    %16 = vector.load %arg5[%c0_13, %c0_14] : memref<1x128xf32, #tpu.memory_space<vmem>>, vector<1x128xf32>
    %17 = vector.broadcast %16 : vector<1x128xf32> to vector<128x128xf32>
    %18 = arith.addf %15, %17 : vector<128x128xf32>
    %c0_15 = arith.constant 0 : index
    %c0_16 = arith.constant 0 : index
    %19 = vector.load %arg6[%c0_15, %c0_16] : memref<128x128xf32, #tpu.memory_space<vmem>>, vector<128x128xf32>
    tpu.vector_store %arg6[%c0_15, %c0_16], %18 {strides = array<i32>} : memref<128x128xf32, #tpu.memory_space<vmem>>, vector<128x128xf32>,
    return
  }
}

</mosaic_0001>

<bundles_post_ra>
// kernel: tpu_custom_call.1
= control target key start
LH: loop header
LB: loop body
LE: loop exit
PB: predicated region body
PF: predicated region fallthrough
CT: control target
= control target key end

     0   :  { %11 = vsyncpa [#allocation3], 0  ;;  %s1238_s0 = inlined_call_operand.vmem [shape: bf16[128,128], index: 0, kind: input, shape index: {}]   ;;  %s1239_s1 = inlined_call_operand.vmem [shape: bf16[128,64], index: 1, kind: input, shape index: {}]   ;;  %s1240_s2 = inlined_call_operand.vmem [shape: bf16[64,128], index: 2, kind: input, shape index: {}]   ;;  %s1241_s3 = inlined_call_operand.vmem [shape: f32[1,128], index: 3, kind: input, shape index: {}]   ;;  %s1242_s4 = inlined_call_operand.hbm [shape: bf16[128,128], index: 4, kind: input, shape index: {}]   ;;  %s1243_s5 = inlined_call_operand.vmem [shape: f32[1,128], index: 5, kind: input, shape index: {}]   ;;  %s1244_s6 = inlined_call_operand.hbm [shape: f32[128,128], index: 6, kind: output, shape index: {}]  }
   0x1   :  { %12 = vsyncpa [#allocation4], 0  ;;  %s1071_s21 = smov [#allocation2]   ;;  %s1023_s25 = scalar_lea.hbm %s1242_s4, 1024 }
   0x2   :  { %s26_s22 = sshll.u32 %s1071_s21, 4  ;;  %p1024_p0 = scmp.ne.s32.totalorder %s1242_s4, %s1023_s25  ;;  %s27_s22 = int_to_ptr.vmem [resolvable:$true] %s26_s22 }
   0x3   :  { %p1027_p1 = scmp.lt.u32.totalorder %s1023_s25, %s1242_s4 }
   0x5   :  { %p1029_p2 = pnand %p1027_p1, %p1024_p0 }
   0x7   :  { %1032 = shalt.err (!%p1029_p2)
}
   0x8   :  { %s1033_s30 = scalar_lea.vmem %s27_s22, 1024  ;;  %p1038_p4 = scmp.lt.s32.totalorder %s27_s22, %s27_s22 }
   0x9   :  { %p1034_p3 = scmp.ne.s32.totalorder %s27_s22, %s1033_s30  ;;  %p1039_p5 = scmp.lt.s32.totalorder %s1033_s30, %s1033_s30 }
   0xb   :  { %p1040_p6 = por %p1039_p5, %p1038_p4 }
   0xd   :  { %p1041_p7 = pnand %p1040_p6, %p1034_p3 }
   0xf   :  { %1044 = shalt.err (!%p1041_p7)
}
  0x10   :  { %s1072_s7 = smov 64   ;;  %s1073_s8 = smov 4  }
  0x11   :  { %32 = dma.hbm_to_vmem [thread:$0]  %s1242_s4, 1024, %s27_s22, [#allocation3], %s1072_s7, %s1072_s7, %s1073_s8  }
  0x12   :  { %1067 = dma.done.wait [#allocation3], 1024  }
  0x13   :  { %1068 = vsyncadd [#allocation3], 4294966272  ;;  %v995_v0 = vld [vmem:[%s1240_s2] sm:$0xff]   ;;  %v996_v1 = vld [vmem:[%s1240_s2 + $0x8] sm:$0xff]   ;;  %vm143_vm0 = vcmask 523264  }
  0x14   :  { %853 = vmatprep.subr.bf16.mxu0 %v995_v0  ;;  %v997_v2 = vld [vmem:[%s1240_s2 + $0x10] sm:$0xff]   ;;  %v999_v3 = vld [vmem:[%s1239_s1] sm:$0xff]   ;;  %v998_v4 = vld [vmem:[%s1240_s2 + $0x18] sm:$0xff]  }
  0x15   :  { %854 = vmatpush3.bf16.msra.mxu0 %v995_v0  ;;  %861 = vmatprep.mubr.msk.bf16.mxu0 %vm143_vm0, %v999_v3  ;;  %v1000_v5 = vld [vmem:[%s1239_s1 + $0x8] sm:$0xff]   ;;  %v1001_v6 = vld [vmem:[%s1239_s1 + $0x10] sm:$0xff]   ;;  %v1002_v7 = vld [vmem:[%s1239_s1 + $0x18] sm:$0xff]  }
  0x16   :  { %855 = vmatprep.subr.bf16.mxu0 %v996_v1  ;;  %v1003_v8 = vld [vmem:[%s1239_s1 + $0x20] sm:$0xff]   ;;  %v1004_v9 = vld [vmem:[%s1239_s1 + $0x28] sm:$0xff]   ;;  %v1005_v10 = vld [vmem:[%s1239_s1 + $0x30] sm:$0xff]  }
  0x17   :  { %v1006_v11 = vld [vmem:[%s1239_s1 + $0x38] sm:$0xff]   ;;  %v1171_v12 = vld [vmem:[%s1238_s0] sm:$0xff]   ;;  %v1016_v14 = vld [vmem:[#allocation2 + $0x8] sm:$0xff]  }
  0x18   :  { %893 = vmatprep.mubr.bf16.mxu1 %v1171_v12  ;;  %v1015_v13 = vld [vmem:[#allocation2] sm:$0xff]   ;;  %v1017_v15 = vld [vmem:[#allocation2 + $0x10] sm:$0xff]   ;;  %v1018_v16 = vld [vmem:[#allocation2 + $0x18] sm:$0xff]  }
  0x19   :  { %856 = vmatpush3.bf16.msra.mxu0 %v996_v1  ;;  %v1019_v17 = vld [vmem:[#allocation2 + $0x20] sm:$0xff]   ;;  %v1020_v18 = vld [vmem:[#allocation2 + $0x28] sm:$0xff]   ;;  %v1009_v44 = vld [vmem:[%s1238_s0 + $0x10] sm:$0xff]  }
  0x1a   :  { %857 = vmatprep.subr.bf16.mxu0 %v997_v2  ;;  %v1177_v43 = vld [vmem:[%s1238_s0 + $0x8] sm:$0xff]   ;;  %v1186_v45 = vld [vmem:[%s1238_s0 + $0x18] sm:$0xff]   ;;  %v1191_v46 = vld [vmem:[%s1238_s0 + $0x20] sm:$0xff]  }
  0x1b   :  { %v1198_v47 = vld [vmem:[%s1238_s0 + $0x28] sm:$0xff]   ;;  %v1203_v48 = vld [vmem:[%s1238_s0 + $0x30] sm:$0xff]   ;;  %v1210_v49 = vld [vmem:[%s1238_s0 + $0x38] sm:$0xff]  }
  0x1c   :  { %v1021_v50 = vld [vmem:[#allocation2 + $0x30] sm:$0xff]   ;;  %v1022_v51 = vld [vmem:[#allocation2 + $0x38] sm:$0xff]   ;;  %v775_v52 = vld [vmem:[%s1241_s3] ss:$0 sm:$0xff] }
  0x1d   :  { %858 = vmatpush3.bf16.msra.mxu0 %v997_v2 }
  0x1e   :  { %859 = vmatprep.subr.bf16.mxu0 %v998_v4 }
  0x21   :  { %860 = vmatpush3.bf16.msra.mxu0 %v998_v4 }
  0x22   :  { %909 = vmatprep.subr.bf16.mxu0 %v1015_v13 }
  0x24   :  { %862 = vmatmul.mubr.msk.bf16.vlgmr.msra.gmra.mrb[0].mxu0 %vm143_vm0, %v1000_v5 }
  0x25   :  { %865 = vmatprep.mubr.msk.bf16.mxu0 %vm143_vm0, %v1001_v6  ;;  %910 = vmatpush3.bf16.msra.mxu0 %v1015_v13 }
  0x26   :  { %911 = vmatprep.subr.bf16.mxu0 %v1016_v14 }
  0x29   :  { %912 = vmatpush3.bf16.msra.mxu0 %v1016_v14 }
  0x2a   :  { %913 = vmatprep.subr.bf16.mxu0 %v1017_v15 }
  0x2c   :  { %866 = vmatmul.mubr.msk.bf16.gmra.mrb[4].mxu0 %vm143_vm0, %v1002_v7 }
  0x2d   :  { %869 = vmatprep.mubr.msk.bf16.mxu0 %vm143_vm0, %v1003_v8  ;;  %914 = vmatpush3.bf16.msra.mxu0 %v1017_v15 }
  0x2e   :  { %915 = vmatprep.subr.bf16.mxu0 %v1018_v16 }
  0x31   :  { %916 = vmatpush3.bf16.msra.mxu0 %v1018_v16 }
  0x32   :  { %917 = vmatprep.subr.bf16.mxu0 %v1019_v17 }
  0x34   :  { %870 = vmatmul.mubr.msk.bf16.gmra.mrb[8].mxu0 %vm143_vm0, %v1004_v9 }
  0x35   :  { %873 = vmatprep.mubr.msk.bf16.mxu0 %vm143_vm0, %v1005_v10  ;;  %918 = vmatpush3.bf16.msra.mxu0 %v1019_v17 }
  0x36   :  { %919 = vmatprep.subr.bf16.mxu0 %v1020_v18 }
  0x39   :  { %920 = vmatpush3.bf16.msra.mxu0 %v1020_v18 }
  0x3a   :  { %921 = vmatprep.subr.bf16.mxu0 %v1021_v50 }
  0x3c   :  { %874 = vmatmul.mubr.msk.bf16.gmra.mrb[12].mxu0 %vm143_vm0, %v1006_v11 }
  0x3d   :  { %922 = vmatpush3.bf16.msra.mxu0 %v1021_v50 }
  0x3e   :  { %923 = vmatprep.subr.bf16.mxu0 %v1022_v51 }
  0x41   :  { %924 = vmatpush3.bf16.msra.mxu0 %v1022_v51 }
  0xf7   :  { %v863_v19 = vpop.f32.mrb[0].mxu0 }
  0xf8   :  { %v202_v20 = vpop.f32.mrb[1].mxu0 }
  0xf9   :  { %v864_v21 = vpop.f32.mrb[2].mxu0 }
  0xfa   :  { %v266_v22 = vpack.c.bf16 %v864_v21, %v863_v19  ;;  %v205_v23 = vpop.f32.mrb[3].mxu0 }
  0xfb   :  { %v265_v24 = vpack.c.bf16 %v205_v23, %v202_v20 }
  0xfd   :  { %877 = vmatprep.subr.bf16.mxu1 %v265_v24 }
  0xfe   :  { %878 = vmatpush3.bf16.msra.mxu1 %v265_v24 }
  0xff   :  { %v867_v25 = vpop.f32.mrb[4].mxu0  ;;  %879 = vmatprep.subr.bf16.mxu1 %v266_v22 }
 0x100   :  { %v218_v26 = vpop.f32.mrb[5].mxu0 }
 0x101   :  { %v868_v27 = vpop.f32.mrb[6].mxu0 }
 0x102   :  { %v268_v28 = vpack.c.bf16 %v868_v27, %v867_v25  ;;  %v221_v29 = vpop.f32.mrb[7].mxu0  ;;  %880 = vmatpush3.bf16.msra.mxu1 %v266_v22 }
 0x103   :  { %v267_v30 = vpack.c.bf16 %v221_v29, %v218_v26 }
 0x105   :  { %881 = vmatprep.subr.bf16.mxu1 %v267_v30 }
 0x106   :  { %882 = vmatpush3.bf16.msra.mxu1 %v267_v30 }
 0x107   :  { %v871_v31 = vpop.f32.mrb[8].mxu0  ;;  %883 = vmatprep.subr.bf16.mxu1 %v268_v28 }
 0x108   :  { %v234_v32 = vpop.f32.mrb[9].mxu0 }
 0x109   :  { %v872_v33 = vpop.f32.mrb[10].mxu0 }
 0x10a   :  { %v270_v34 = vpack.c.bf16 %v872_v33, %v871_v31  ;;  %v237_v35 = vpop.f32.mrb[11].mxu0  ;;  %884 = vmatpush3.bf16.msra.mxu1 %v268_v28 }
 0x10b   :  { %v269_v36 = vpack.c.bf16 %v237_v35, %v234_v32 }
 0x10d   :  { %885 = vmatprep.subr.bf16.mxu1 %v269_v36 }
 0x10e   :  { %886 = vmatpush3.bf16.msra.mxu1 %v269_v36 }
 0x10f   :  { %v875_v37 = vpop.f32.mrb[12].mxu0  ;;  %887 = vmatprep.subr.bf16.mxu1 %v270_v34 }
 0x110   :  { %v250_v38 = vpop.f32.mrb[13].mxu0 }
 0x111   :  { %v876_v39 = vpop.f32.mrb[14].mxu0 }
 0x112   :  { %v272_v40 = vpack.c.bf16 %v876_v39, %v875_v37  ;;  %v253_v41 = vpop.f32.mrb[15].mxu0  ;;  %888 = vmatpush3.bf16.msra.mxu1 %v270_v34 }
 0x113   :  { %v271_v42 = vpack.c.bf16 %v253_v41, %v250_v38 }
 0x115   :  { %889 = vmatprep.subr.bf16.mxu1 %v271_v42 }
 0x116   :  { %890 = vmatpush3.bf16.msra.mxu1 %v271_v42 }
 0x117   :  { %891 = vmatprep.subr.bf16.mxu1 %v272_v40 }
 0x11a   :  { %892 = vmatpush3.bf16.msra.mxu1 %v272_v40 }
 0x11d   :  { %894 = vmatmul.mubr.bf16.vlgmr.msra.gmra.mrb[0].mxu1 %v1177_v43 }
 0x11e   :  { %897 = vmatprep.mubr.bf16.mxu1 %v1009_v44 }
 0x125   :  { %898 = vmatmul.mubr.bf16.gmra.mrb[4].mxu1 %v1186_v45 }
 0x126   :  { %901 = vmatprep.mubr.bf16.mxu1 %v1191_v46 }
 0x12d   :  { %902 = vmatmul.mubr.bf16.gmra.mrb[8].mxu1 %v1198_v47 }
 0x12e   :  { %905 = vmatprep.mubr.bf16.mxu1 %v1203_v48 }
 0x135   :  { %906 = vmatmul.mubr.bf16.gmra.mrb[12].mxu1 %v1210_v49 }
 0x136   :  { %961 = vmatprep.mubr.bf16.mxu1 %v1009_v44 }
 0x1f0   :  { %v895_v53 = vpop.f32.mrb[0].mxu1 }
 0x1f1   :  { %v371_v54 = vadd.f32 %v895_v53, %v775_v52  ;;  %v362_v55 = vpop.f32.mrb[1].mxu1 }
 0x1f2   :  { %v363_v56 = vadd.f32 %v775_v52, %v362_v55  ;;  %v896_v57 = vpop.f32.mrb[2].mxu1 }
 0x1f3   :  { %v374_v58 = vadd.f32 %v896_v57, %v775_v52  ;;  %v365_v59 = vpop.f32.mrb[3].mxu1  ;;  %v427_v61 = vmax.f32 %v371_v54, 0.0 }
 0x1f4   :  { %v366_v60 = vadd.f32 %v775_v52, %v365_v59  ;;  %v425_v63 = vmax.f32 %v363_v56, 0.0 }
 0x1f5   :  { %v428_v62 = vmax.f32 %v374_v58, 0.0 }
 0x1f6   :  { %v426_v0 = vmax.f32 %v366_v60, 0.0 }
 0x1f7   :  { %v442_v1 = vpack.c.bf16 %v428_v62, %v427_v61 }
 0x1f8   :  { %v441_v2 = vpack.c.bf16 %v426_v0, %v425_v63  ;;  %v899_v3 = vpop.f32.mrb[4].mxu1 }
 0x1f9   :  { %v387_v4 = vadd.f32 %v899_v3, %v775_v52  ;;  %v378_v5 = vpop.f32.mrb[5].mxu1 }
 0x1fa   :  { %v379_v6 = vadd.f32 %v775_v52, %v378_v5  ;;  %v900_v7 = vpop.f32.mrb[6].mxu1  ;;  %925 = vmatprep.mubr.bf16.mxu0 %v441_v2 }
 0x1fb   :  { %v390_v8 = vadd.f32 %v900_v7, %v775_v52  ;;  %v381_v9 = vpop.f32.mrb[7].mxu1  ;;  %926 = vmatmul.mubr.bf16.vlgmr.msra.gmra.mrb[16].mxu0 %v442_v1  ;;  %v431_v11 = vmax.f32 %v387_v4, 0.0 }
 0x1fc   :  { %v382_v10 = vadd.f32 %v775_v52, %v381_v9  ;;  %v429_v14 = vmax.f32 %v379_v6, 0.0 }
 0x1fd   :  { %v432_v13 = vmax.f32 %v390_v8, 0.0 }
 0x1fe   :  { %v430_v15 = vmax.f32 %v382_v10, 0.0 }
 0x1ff   :  { %v444_v16 = vpack.c.bf16 %v432_v13, %v431_v11  ;;  %v792_v11 = vld [vmem:[%s1243_s5] ss:$0 sm:$0xff]  ;;  %s1074_s5 = smov [#allocation5]  }
 0x200   :  { %v443_v17 = vpack.c.bf16 %v430_v15, %v429_v14  ;;  %v903_v18 = vpop.f32.mrb[8].mxu1  ;;  %s743_s25 = sshll.u32 %s1074_s5, 4  ;;  %s744_s25 = int_to_ptr.vmem [resolvable:$true] %s743_s25 }
 0x201   :  { %v403_v19 = vadd.f32 %v903_v18, %v775_v52  ;;  %v394_v20 = vpop.f32.mrb[9].mxu1  ;;  %s1045_s2 = scalar_lea.vmem %s744_s25, 2048  ;;  %p1050_p9 = scmp.lt.s32.totalorder %s744_s25, %s744_s25 }
 0x202   :  { %v395_v21 = vadd.f32 %v775_v52, %v394_v20  ;;  %v904_v22 = vpop.f32.mrb[10].mxu1  ;;  %929 = vmatprep.mubr.bf16.mxu0 %v443_v17  ;;  %p1046_p8 = scmp.ne.s32.totalorder %s744_s25, %s1045_s2  ;;  %p1051_p10 = scmp.lt.s32.totalorder %s1045_s2, %s1045_s2 }
 0x203   :  { %v406_v23 = vadd.f32 %v904_v22, %v775_v52  ;;  %v397_v24 = vpop.f32.mrb[11].mxu1  ;;  %930 = vmatmul.mubr.bf16.gmra.mrb[20].mxu0 %v444_v16  ;;  %v435_v26 = vmax.f32 %v403_v19, 0.0 }
 0x204   :  { %v398_v25 = vadd.f32 %v775_v52, %v397_v24  ;;  %v433_v28 = vmax.f32 %v395_v21, 0.0  ;;  %p1052_p11 = por %p1051_p10, %p1050_p9 }
 0x205   :  { %v436_v27 = vmax.f32 %v406_v23, 0.0 }
 0x206   :  { %v434_v29 = vmax.f32 %v398_v25, 0.0  ;;  %p1053_p12 = pnand %p1052_p11, %p1046_p8 }
 0x207   :  { %v446_v30 = vpack.c.bf16 %v436_v27, %v435_v26 }
 0x208   :  { %v445_v31 = vpack.c.bf16 %v434_v29, %v433_v28  ;;  %v907_v32 = vpop.f32.mrb[12].mxu1 }
 0x209   :  { %v419_v33 = vadd.f32 %v907_v32, %v775_v52  ;;  %v410_v34 = vpop.f32.mrb[13].mxu1 }
 0x20a   :  { %v411_v35 = vadd.f32 %v775_v52, %v410_v34  ;;  %v908_v36 = vpop.f32.mrb[14].mxu1  ;;  %933 = vmatprep.mubr.bf16.mxu0 %v445_v31 }
 0x20b   :  { %v422_v37 = vadd.f32 %v908_v36, %v775_v52  ;;  %v413_v38 = vpop.f32.mrb[15].mxu1  ;;  %934 = vmatmul.mubr.bf16.gmra.mrb[24].mxu0 %v446_v30  ;;  %v439_v40 = vmax.f32 %v419_v33, 0.0 }
 0x20c   :  { %v414_v39 = vadd.f32 %v775_v52, %v413_v38  ;;  %v437_v42 = vmax.f32 %v411_v35, 0.0 }
 0x20d   :  { %v440_v41 = vmax.f32 %v422_v37, 0.0 }
 0x20e   :  { %v438_v44 = vmax.f32 %v414_v39, 0.0 }
 0x20f   :  { %v448_v50 = vpack.c.bf16 %v440_v41, %v439_v40 }
 0x210   :  { %v447_v51 = vpack.c.bf16 %v438_v44, %v437_v42 }
 0x212   :  { %937 = vmatprep.mubr.bf16.mxu0 %v447_v51 }
 0x213   :  { %938 = vmatmul.mubr.bf16.gmra.mrb[28].mxu0 %v448_v50 }
 0x214   :  { %957 = vmatprep.mubr.bf16.mxu0 %v1171_v12 }
 0x2ce   :  { %v927_v53 = vpop.f32.mrb[16].mxu0 }
 0x2cf   :  { %v547_v54 = vpop.f32.mrb[17].mxu0 }
 0x2d0   :  { %v928_v55 = vpop.f32.mrb[18].mxu0 }
 0x2d1   :  { %v611_v56 = vpack.c.bf16 %v928_v55, %v927_v53  ;;  %v550_v57 = vpop.f32.mrb[19].mxu0 }
 0x2d2   :  { %v610_v58 = vpack.c.bf16 %v550_v57, %v547_v54 }
 0x2d4   :  { %941 = vmatprep.subr.bf16.mxu0 %v610_v58  ;;  %973 = vmatprep.subr.bf16.mxu1 %v610_v58 }
 0x2d5   :  { %942 = vmatpush3.bf16.msra.mxu0 %v610_v58  ;;  %981 = vmatpush3.bf16.msra.mxu1 %v610_v58 }
 0x2d6   :  { %v931_v52 = vpop.f32.mrb[20].mxu0  ;;  %943 = vmatprep.subr.bf16.mxu0 %v611_v56  ;;  %974 = vmatprep.subr.bf16.mxu1 %v611_v56 }
 0x2d7   :  { %v563_v59 = vpop.f32.mrb[21].mxu0 }
 0x2d8   :  { %v932_v60 = vpop.f32.mrb[22].mxu0 }
 0x2d9   :  { %v613_v61 = vpack.c.bf16 %v932_v60, %v931_v52  ;;  %v566_v62 = vpop.f32.mrb[23].mxu0  ;;  %944 = vmatpush3.bf16.msra.mxu0 %v611_v56  ;;  %982 = vmatpush3.bf16.msra.mxu1 %v611_v56 }
 0x2da   :  { %v612_v12 = vpack.c.bf16 %v566_v62, %v563_v59 }
 0x2dc   :  { %945 = vmatprep.subr.bf16.mxu0 %v612_v12  ;;  %975 = vmatprep.subr.bf16.mxu1 %v612_v12 }
 0x2dd   :  { %946 = vmatpush3.bf16.msra.mxu0 %v612_v12  ;;  %983 = vmatpush3.bf16.msra.mxu1 %v612_v12 }
 0x2de   :  { %v935_v63 = vpop.f32.mrb[24].mxu0  ;;  %947 = vmatprep.subr.bf16.mxu0 %v613_v61  ;;  %976 = vmatprep.subr.bf16.mxu1 %v613_v61 }
 0x2df   :  { %v579_v0 = vpop.f32.mrb[25].mxu0 }
 0x2e0   :  { %v936_v1 = vpop.f32.mrb[26].mxu0 }
 0x2e1   :  { %v615_v2 = vpack.c.bf16 %v936_v1, %v935_v63  ;;  %v582_v3 = vpop.f32.mrb[27].mxu0  ;;  %948 = vmatpush3.bf16.msra.mxu0 %v613_v61  ;;  %984 = vmatpush3.bf16.msra.mxu1 %v613_v61 }
 0x2e2   :  { %v614_v4 = vpack.c.bf16 %v582_v3, %v579_v0 }
 0x2e4   :  { %949 = vmatprep.subr.bf16.mxu0 %v614_v4  ;;  %977 = vmatprep.subr.bf16.mxu1 %v614_v4 }
 0x2e5   :  { %950 = vmatpush3.bf16.msra.mxu0 %v614_v4  ;;  %985 = vmatpush3.bf16.msra.mxu1 %v614_v4 }
 0x2e6   :  { %v939_v5 = vpop.f32.mrb[28].mxu0  ;;  %951 = vmatprep.subr.bf16.mxu0 %v615_v2  ;;  %978 = vmatprep.subr.bf16.mxu1 %v615_v2 }
 0x2e7   :  { %v595_v6 = vpop.f32.mrb[29].mxu0 }
 0x2e8   :  { %v940_v7 = vpop.f32.mrb[30].mxu0 }
 0x2e9   :  { %v617_v8 = vpack.c.bf16 %v940_v7, %v939_v5  ;;  %v598_v9 = vpop.f32.mrb[31].mxu0  ;;  %952 = vmatpush3.bf16.msra.mxu0 %v615_v2  ;;  %986 = vmatpush3.bf16.msra.mxu1 %v615_v2 }
 0x2ea   :  { %v616_v10 = vpack.c.bf16 %v598_v9, %v595_v6 }
 0x2ec   :  { %953 = vmatprep.subr.bf16.mxu0 %v616_v10  ;;  %979 = vmatprep.subr.bf16.mxu1 %v616_v10 }
 0x2ed   :  { %954 = vmatpush3.bf16.msra.mxu0 %v616_v10  ;;  %987 = vmatpush3.bf16.msra.mxu1 %v616_v10 }
 0x2ee   :  { %955 = vmatprep.subr.bf16.mxu0 %v617_v8  ;;  %980 = vmatprep.subr.bf16.mxu1 %v617_v8 }
 0x2f1   :  { %956 = vmatpush3.bf16.msra.mxu0 %v617_v8  ;;  %988 = vmatpush3.bf16.msra.mxu1 %v617_v8 }
 0x2f4   :  { %962 = vmatmul.mubr.bf16.vlgmr.msra.gmra.mrb[16].mxu1 %v1186_v45  ;;  %958 = vmatmul.mubr.bf16.vlgmr.msra.gmra.mrb[32].mxu0 %v1177_v43 }
 0x2f5   :  { %965 = vmatprep.mubr.bf16.mxu1 %v1191_v46 }
 0x2fc   :  { %966 = vmatmul.mubr.bf16.gmra.mrb[20].mxu1 %v1198_v47 }
 0x2fd   :  { %969 = vmatprep.mubr.bf16.mxu1 %v1203_v48 }
 0x304   :  { %970 = vmatmul.mubr.bf16.gmra.mrb[24].mxu1 %v1210_v49 }
 0x3c7   :  { %v963_v13 = vpop.f32.mrb[16].mxu1  ;;  %v959_v14 = vpop.f32.mrb[32].mxu0 }
 0x3c8   :  { %v684_v15 = vadd.f32 %v963_v13, %v792_v11  ;;  %v675_v16 = vpop.f32.mrb[17].mxu1  ;;  %v668_v17 = vadd.f32 %v959_v14, %v792_v11  ;;  %v659_v45 = vpop.f32.mrb[33].mxu0 }
 0x3c9   :  { %v676_v18 = vadd.f32 %v792_v11, %v675_v16  ;;  %v964_v43 = vpop.f32.mrb[18].mxu1  ;;  %v660_v19 = vadd.f32 %v792_v11, %v659_v45  ;;  %v960_v46 = vpop.f32.mrb[34].mxu0 }
 0x3ca   :  { %728 = vst [vmem:[#allocation5 + $0x30] sm:$0xff] %v684_v15  ;;  %v687_v47 = vadd.f32 %v964_v43, %v792_v11  ;;  %v678_v20 = vpop.f32.mrb[19].mxu1  ;;  %724 = vst [vmem:[#allocation5 + $0x10] sm:$0xff] %v668_v17  ;;  %v671_v48 = vadd.f32 %v960_v46, %v792_v11  ;;  %v662_v49 = vpop.f32.mrb[35].mxu0 }
 0x3cb   :  { %726 = vst [vmem:[#allocation5 + $0x20] sm:$0xff] %v676_v18  ;;  %v679_v21 = vadd.f32 %v792_v11, %v678_v20  ;;  %722 = vst [vmem:[#allocation5] sm:$0xff] %v660_v19  ;;  %v663_v22 = vadd.f32 %v792_v11, %v662_v49 }
 0x3cc   :  { %729 = vst [vmem:[#allocation5 + $0x38] sm:$0xff] %v687_v47  ;;  %725 = vst [vmem:[#allocation5 + $0x18] sm:$0xff] %v671_v48 }
 0x3cd   :  { %727 = vst [vmem:[#allocation5 + $0x28] sm:$0xff] %v679_v21  ;;  %723 = vst [vmem:[#allocation5 + $0x8] sm:$0xff] %v663_v22 }
 0x3cf   :  { %v967_v23 = vpop.f32.mrb[20].mxu1 }
 0x3d0   :  { %v700_v24 = vadd.f32 %v967_v23, %v792_v11  ;;  %v691_v25 = vpop.f32.mrb[21].mxu1 }
 0x3d1   :  { %v692_v26 = vadd.f32 %v792_v11, %v691_v25  ;;  %v968_v27 = vpop.f32.mrb[22].mxu1 }
 0x3d2   :  { %732 = vst [vmem:[#allocation5 + $0x50] sm:$0xff] %v700_v24  ;;  %v703_v28 = vadd.f32 %v968_v27, %v792_v11  ;;  %v694_v29 = vpop.f32.mrb[23].mxu1 }
 0x3d3   :  { %730 = vst [vmem:[#allocation5 + $0x40] sm:$0xff] %v692_v26  ;;  %v695_v30 = vadd.f32 %v792_v11, %v694_v29 }
 0x3d4   :  { %733 = vst [vmem:[#allocation5 + $0x58] sm:$0xff] %v703_v28 }
 0x3d5   :  { %731 = vst [vmem:[#allocation5 + $0x48] sm:$0xff] %v695_v30 }
 0x3d7   :  { %v971_v31 = vpop.f32.mrb[24].mxu1 }
 0x3d8   :  { %v716_v32 = vadd.f32 %v971_v31, %v792_v11  ;;  %v707_v33 = vpop.f32.mrb[25].mxu1 }
 0x3d9   :  { %v708_v34 = vadd.f32 %v792_v11, %v707_v33  ;;  %v972_v35 = vpop.f32.mrb[26].mxu1 }
 0x3da   :  { %736 = vst [vmem:[#allocation5 + $0x70] sm:$0xff] %v716_v32  ;;  %v719_v36 = vadd.f32 %v972_v35, %v792_v11  ;;  %v710_v37 = vpop.f32.mrb[27].mxu1 }
 0x3db   :  { %734 = vst [vmem:[#allocation5 + $0x60] sm:$0xff] %v708_v34  ;;  %v711_v38 = vadd.f32 %v792_v11, %v710_v37 }
 0x3dc   :  { %737 = vst [vmem:[#allocation5 + $0x78] sm:$0xff] %v719_v36 }
 0x3dd   :  { %735 = vst [vmem:[#allocation5 + $0x68] sm:$0xff] %v711_v38 }
 0x3de   :  { %1056 = shalt.err (!%p1053_p12)
}
 0x3df   :  { %s1057_s28 = scalar_lea.hbm %s1244_s6, 2048 }
 0x3e0   :  { %p1058_p13 = scmp.ne.s32.totalorder %s1244_s6, %s1057_s28  ;;  %p1061_p0 = scmp.lt.u32.totalorder %s1057_s28, %s1244_s6 }
 0x3e2   :  { %p1063_p1 = pnand %p1061_p0, %p1058_p13 }
 0x3e4   :  { %1066 = shalt.err (!%p1063_p1)
}
 0x3e5   :  { %s1075_s9 = smov 128   ;;  %s1076_s10 = smov 8  }
 0x3e6   :  { %749 = dma.vmem_to_hbm [thread:$0]  %s744_s25, 2048, %s1244_s6, [#allocation4], %s1075_s9, %s1075_s9, %s1076_s10  }
 0x3e7   :  { %1069 = dma.done.wait [#allocation4], 2048  }
 0x3e8   :  { %1070 = vsyncadd [#allocation4], 4294965248 }
 0x3e9   :  { %753 = vsyncpa [#allocation3], 1 }
 0x3ea   :  { %754 = vsyncpa [#allocation4], 1 }

</bundles_post_ra>
